<compile_context>
chip_gen: v6e
topology: v6e:2x2x1
jax: 0.10.0
libtpu: 0.0.40
codegen_flags: <defaults>
</compile_context>

<pallas_src>
import functools

import jax
import jax.numpy as jnp
import numpy as np
from jax.experimental import pallas as pl
from jax.experimental.pallas import tpu as pltpu


# --------------------------------------------------------------------------
# Generation-aware tiling / VMEM budgeting
# --------------------------------------------------------------------------
def _vmem_capacity_bytes():
    try:
        return int(pltpu.get_tpu_info().vmem_capacity_bytes)
    except Exception:
        return 64 * 1024 * 1024          # conservative (v7x per-TensorCore VMEM)


def _is_pre_v6_chip():
    """True for v5e and older (no bf16 EUP path -> keep the softmax exp in f32)."""
    try:
        info = pltpu.get_tpu_info()
        txt = str(getattr(info, "chip_version", info)).lower()
        return any(tag in txt for tag in ("v2", "v3", "v4", "v5"))
    except Exception:
        return False


def _estimate_step_vmem(n, tq, e, hg, hd, itemsize):
    """Rough per-grid-step VMEM bytes: double-buffered streamed blocks plus the
    dominant in-kernel f32 temporaries."""
    streamed = (n * e                     # query rows (source of K/V)
                + hg * tq * n             # attn_bias tile
                + 3 * tq * n              # delta_pos tile
                + 3 * hg * e * hd         # per-head q/k/v weights
                + hg * 3 * hd             # per-head force weights
                + 3 * hg * hd + 3)        # biases
    live_f32 = (2 * hg * tq * n           # attn + probs
                + hg * (tq + 2 * n) * hd  # q/k/v head stacks
                + 3 * hg * n              # s = fw . v^T
                + 2 * tq * n)             # per-component reduction temporaries
    return 2 * streamed * itemsize + 4 * live_f32


def _choose_tiling(n, e, num_heads, hd, itemsize, vmem_cap,
                   heads_per_group=None, tile_q=None):
    budget = int(vmem_cap * 0.65)         # headroom for compiler scratch / pipelining
    if heads_per_group is not None:
        assert num_heads % heads_per_group == 0
        hg_cands = [heads_per_group]
    else:
        hg_cands = [d for d in range(min(num_heads, 8), 0, -1) if num_heads % d == 0]
    if tile_q is not None:
        assert n % tile_q == 0
        tq_cands = [tile_q]
    else:
        tq_cands = sorted({t for t in (512, 256, 128, 64, 32, 16, 8, n)
                           if t <= n and n % t == 0 and (t % 8 == 0 or t == n)},
                          reverse=True)

    combos = [(hg, tq, _estimate_step_vmem(n, tq, e, hg, hd, itemsize))
              for hg in hg_cands for tq in tq_cands]
    fits = [c for c in combos if c[2] <= budget]
    if fits:      # fewest grid steps first, then the widest q tile
        hg, tq, est = min(fits, key=lambda c: ((n // c[1]) * (num_heads // c[0]), -c[1]))
    else:         # nothing fits the budget: smallest footprint
        hg, tq, est = min(combos, key=lambda c: c[2])

    vmem_limit = int(min(max(vmem_cap - (2 << 20), 1 << 20),
                         max(1.3 * est + (8 << 20), 32 << 20)))
    return hg, tq, vmem_limit


# --------------------------------------------------------------------------
# Kernel
# --------------------------------------------------------------------------
def _node_task_head_kernel(heads_per_group, tile_q, exp_dtype, approx_recip,
                           q_ref, bias_ref, dpos_ref,
                           wq_ref, wk_ref, wv_ref, bq_ref, bk_ref, bv_ref,
                           fwt_ref, fb_ref, o_ref, acc_ref):
    g = pl.program_id(2)                       # head-group index (reduction axis)
    n = q_ref.shape[1]
    tq = tile_q
    dt = q_ref.dtype                           # streaming / MXU-input dtype

    x = q_ref[0]                               # (n, E): source rows for K/V
    if tq == n:                                # static fast path (also the test path)
        xq = x
    else:
        row0 = pl.multiple_of(pl.program_id(1) * tq, tq)
        xq = q_ref[0, pl.ds(row0, tq), :]      # (tq, E)

    def project(rows, w_ref, b_ref):           # per-head 2-D matmuls, head-major stack
        return jnp.stack([
            (jnp.dot(rows, w_ref[0, h], preferred_element_type=jnp.float32)
             + b_ref[0, h]).astype(dt)
            for h in range(heads_per_group)])  # (Hg, rows, hd)

    q_h = project(xq, wq_ref, bq_ref)          # (Hg, tq, hd)  (softmax scaling folded in)
    k_h = project(x, wk_ref, bk_ref)           # (Hg, n,  hd)
    v_h = project(x, wv_ref, bv_ref)           # (Hg, n,  hd)

    # Attention probabilities for all heads of the group at once.
    attn = jnp.einsum('hqd,hkd->hqk', q_h, k_h,
                      preferred_element_type=jnp.float32)         # (Hg, tq, n) f32
    attn = attn + bias_ref[0]                  # bf16 bias promotes on consumption
    attn = attn - jnp.max(attn, axis=-1, keepdims=True)
    p = jnp.exp(attn.astype(exp_dtype)).astype(jnp.float32)
    denom = jnp.sum(p, axis=-1, keepdims=True)
    p = p * pl.reciprocal(denom, approx=approx_recip)             # softmax(-1)
    # TODO(synk): dropout(p=0.1) on the probabilities is stochastic; eval-mode
    # (identity) semantics are implemented here.

    # s[h, c, m] = sum_d fw[h, c, d] * v[h, m, d]
    s = jnp.einsum('hcd,hmd->hcm', fwt_ref[0], v_h,
                   preferred_element_type=jnp.float32)            # (Hg, 3, n) f32

    # f[q, c] = sum_m dpos[c, q, m] * sum_h p[h, q, m] * s[h, c, m]
    f_cols = []
    for c in range(3):
        u_c = jnp.sum(p * s[:, c:c + 1, :], axis=0)               # (tq, n) f32, transient
        f_cols.append(jnp.sum(dpos_ref[0, c] * u_c, axis=-1, keepdims=True))
    f_part = jnp.concatenate(f_cols, axis=-1)                     # (tq, 3) f32

    @pl.when(g == 0)
    def _():                                   # start from the force biases
        acc_ref[...] = jnp.broadcast_to(fb_ref[...], (tq, 3))

    acc_ref[...] = acc_ref[...] + f_part

    @pl.when(g == pl.num_programs(2) - 1)
    def _():                                   # single output store per q-tile
        o_ref[0] = acc_ref[...]


# --------------------------------------------------------------------------
# Wrapper
# --------------------------------------------------------------------------
def node_task_head_forward(query, attn_bias, delta_pos, params, num_heads,
                           *, heads_per_group=None, tile_q=None,
                           compute_dtype=jnp.bfloat16, exp_dtype=None,
                           delta_pos_layout="bnnc"):
    bsz, n_node, embed_dim = query.shape
    assert embed_dim % num_heads == 0
    head_dim = embed_dim // num_heads
    scaling = float(head_dim) ** (-0.5)
    cd = jnp.dtype(compute_dtype)
    approx_recip = cd != jnp.dtype(jnp.float32)

    vmem_cap = _vmem_capacity_bytes()
    hg, tq, vmem_limit = _choose_tiling(n_node, embed_dim, num_heads, head_dim,
                                        cd.itemsize, vmem_cap,
                                        heads_per_group=heads_per_group,
                                        tile_q=tile_q)
    n_groups = num_heads // hg

    if exp_dtype is None:   # bf16 exp only where the EUP has a bf16 path (v6e/v7x)
        exp_dtype = (jnp.float32 if (cd == jnp.dtype(jnp.float32) or _is_pre_v6_chip())
                     else jnp.bfloat16)
    exp_dtype = jnp.dtype(exp_dtype)

    # Streamed tensors in the compute dtype (bf16 default -> half the HBM traffic).
    q_in = query.astype(cd)
    bias4 = attn_bias.reshape(bsz, num_heads, n_node, n_node).astype(cd)
    if delta_pos_layout == "bcnn":
        dpos_t = delta_pos.astype(cd)                  # already (b, 3, n, n)
    else:
        # TODO(synk): have the upstream producer emit delta_pos as (b, 3, n, n) in the
        # compute dtype so this full-tensor transpose+cast HBM pass disappears.
        dpos_t = jnp.transpose(delta_pos, (0, 3, 1, 2)).astype(cd)

    # Per-head weight blocks.  PyTorch Linear stores weight as (out, in); the output
    # features of head h are rows h*hd..(h+1)*hd.  Softmax scaling is folded into Q.
    def per_head(w):                  # (E, E) -> (G, Hg, E, hd), used as x @ w_h
        w_h = jnp.transpose(w.reshape(num_heads, head_dim, embed_dim), (0, 2, 1))
        return w_h.reshape(n_groups, hg, embed_dim, head_dim)

    def per_head_bias(b):             # (E,) -> (G, Hg, 1, hd), kept in f32
        return b.reshape(n_groups, hg, 1, head_dim).astype(jnp.float32)

    wq_g = (per_head(params["wq"]) * scaling).astype(cd)
    wk_g = per_head(params["wk"]).astype(cd)
    wv_g = per_head(params["wv"]).astype(cd)
    bq_g = per_head_bias(params["bq"]) * scaling
    bk_g = per_head_bias(params["bk"])
    bv_g = per_head_bias(params["bv"])

    fw_full = jnp.stack([params["fw1"].reshape(embed_dim),
                         params["fw2"].reshape(embed_dim),
                         params["fw3"].reshape(embed_dim)], axis=0)       # (3, E)
    fwt_g = jnp.transpose(fw_full.reshape(3, num_heads, head_dim),
                          (1, 0, 2)).reshape(n_groups, hg, 3, head_dim).astype(cd)
    fb = jnp.stack([params["fb1"].reshape(()), params["fb2"].reshape(()),
                    params["fb3"].reshape(())]).reshape(1, 3).astype(jnp.float32)

    kernel = functools.partial(_node_task_head_kernel, hg, tq, exp_dtype, approx_recip)

    in_specs = [
        pl.BlockSpec((1, n_node, embed_dim), lambda b, t, g: (b, 0, 0)),          # query
        pl.BlockSpec((1, hg, tq, n_node), lambda b, t, g: (b, g, t, 0)),          # attn_bias
        pl.BlockSpec((1, 3, tq, n_node), lambda b, t, g: (b, 0, t, 0)),           # delta_pos
        pl.BlockSpec((1, hg, embed_dim, head_dim), lambda b, t, g: (g, 0, 0, 0)),  # Wq
        pl.BlockSpec((1, hg, embed_dim, head_dim), lambda b, t, g: (g, 0, 0, 0)),  # Wk
        pl.BlockSpec((1, hg, embed_dim, head_dim), lambda b, t, g: (g, 0, 0, 0)),  # Wv
        pl.BlockSpec((1, hg, 1, head_dim), lambda b, t, g: (g, 0, 0, 0)),          # bq
        pl.BlockSpec((1, hg, 1, head_dim), lambda b, t, g: (g, 0, 0, 0)),          # bk
        pl.BlockSpec((1, hg, 1, head_dim), lambda b, t, g: (g, 0, 0, 0)),          # bv
        pl.BlockSpec((1, hg, 3, head_dim), lambda b, t, g: (g, 0, 0, 0)),          # force W
        pl.BlockSpec((1, 3), lambda b, t, g: (0, 0)),                              # force b
    ]
    out_spec = pl.BlockSpec((1, tq, 3), lambda b, t, g: (b, t, 0))

    return pl.pallas_call(
        kernel,
        out_shape=jax.ShapeDtypeStruct((bsz, n_node, 3), jnp.float32),
        grid=(bsz, n_node // tq, n_groups),
        in_specs=in_specs,
        out_specs=out_spec,
        scratch_shapes=[pltpu.VMEM((tq, 3), jnp.float32)],
        compiler_params=pltpu.CompilerParams(
            dimension_semantics=("parallel", "parallel", "arbitrary"),
            vmem_limit_bytes=vmem_limit),
    )(q_in, bias4, dpos_t, wq_g, wk_g, wv_g, bq_g, bk_g, bv_g, fwt_g, fb)


# --------------------------------------------------------------------------
# Parameters / reference / test harness
# --------------------------------------------------------------------------
def init_params(key, embed_dim):
    ks = jax.random.split(key, 12)
    std = 0.1
    n = jax.random.normal
    return {
        "wq": n(ks[0], (embed_dim, embed_dim), jnp.float32) * std,
        "bq": n(ks[1], (embed_dim,), jnp.float32) * std,
        "wk": n(ks[2], (embed_dim, embed_dim), jnp.float32) * std,
        "bk": n(ks[3], (embed_dim,), jnp.float32) * std,
        "wv": n(ks[4], (embed_dim, embed_dim), jnp.float32) * std,
        "bv": n(ks[5], (embed_dim,), jnp.float32) * std,
        "fw1": n(ks[6], (1, embed_dim), jnp.float32) * std,
        "fb1": n(ks[7], (1,), jnp.float32) * std,
        "fw2": n(ks[8], (1, embed_dim), jnp.float32) * std,
        "fb2": n(ks[9], (1,), jnp.float32) * std,
        "fw3": n(ks[10], (1, embed_dim), jnp.float32) * std,
        "fb3": n(ks[11], (1,), jnp.float32) * std,
    }


def ref_forward(query, attn_bias, delta_pos, p, num_heads):
    """Pure-JAX mirror of the PyTorch forward (eval mode: dropout = identity)."""
    bsz, n, E = query.shape
    hd = E // num_heads
    scaling = float(hd) ** (-0.5)

    def lin(x, w, b):
        return x @ w.T + b

    q = lin(query, p["wq"], p["bq"]).reshape(bsz, n, num_heads, hd)
    q = jnp.transpose(q, (0, 2, 1, 3)) * scaling
    k = lin(query, p["wk"], p["bk"]).reshape(bsz, n, num_heads, hd)
    k = jnp.transpose(k, (0, 2, 1, 3))
    v = lin(query, p["wv"], p["bv"]).reshape(bsz, n, num_heads, hd)
    v = jnp.transpose(v, (0, 2, 1, 3))

    attn = q @ jnp.swapaxes(k, -1, -2)
    probs = jax.nn.softmax(attn.reshape(-1, n, n) + attn_bias, axis=-1)
    probs = probs.reshape(bsz, num_heads, n, n)
    rot = probs[..., None] * delta_pos[:, None, :, :, :]
    rot = jnp.transpose(rot, (0, 1, 4, 2, 3))                 # (b, H, 3, n, n)
    x = rot @ v[:, :, None, :, :]                             # (b, H, 3, n, hd)
    x = jnp.transpose(x, (0, 3, 2, 1, 4)).reshape(bsz, n, 3, E)
    f1 = x[:, :, 0, :] @ p["fw1"].T + p["fb1"]
    f2 = x[:, :, 1, :] @ p["fw2"].T + p["fb2"]
    f3 = x[:, :, 2, :] @ p["fw3"].T + p["fb3"]
    return jnp.concatenate([f1, f2, f3], axis=-1).astype(jnp.float32)


if __name__ == "__main__":
    bsz, n_node, embed_dim, num_heads = 2, 8, 32, 4
    key = jax.random.PRNGKey(0)
    kq, kb, kd, kp = jax.random.split(key, 4)

    query = jax.random.normal(kq, (bsz, n_node, embed_dim), jnp.float32)
    attn_bias = jax.random.normal(kb, (bsz * num_heads, n_node, n_node), jnp.float32)
    delta_pos = jax.random.normal(kd, (bsz, n_node, n_node, 3), jnp.float32)
    params = init_params(kp, embed_dim)

    ref = ref_forward(query, attn_bias, delta_pos, params, num_heads)

    # f32 path (exercises the 2-group head reduction): tight check.
    out_f32 = node_task_head_forward(query, attn_bias, delta_pos, params, num_heads,
                                     heads_per_group=2, compute_dtype=jnp.float32)
    out_f32 = jax.block_until_ready(out_f32)
    np.testing.assert_allclose(np.asarray(out_f32), np.asarray(ref),
                               rtol=1e-4, atol=1e-4)

    # bf16 streaming path (auto-selected tiling): f32 accumulation, relaxed tolerance.
    out_bf16 = node_task_head_forward(query, attn_bias, delta_pos, params, num_heads,
                                      compute_dtype=jnp.bfloat16)
    out_bf16 = jax.block_until_ready(out_bf16)
    np.testing.assert_allclose(np.asarray(out_bf16), np.asarray(ref),
                               rtol=3e-2, atol=3e-2)

    print("KERNEL_OK")
</pallas_src>

<mosaic_0001>
module attributes {stable_mosaic.version = 11 : i64} {
  func.func @_node_task_head_kernel(%arg0: i32, %arg1: i32, %arg2: i32, %arg3: memref<1x8x32xf32, #tpu.memory_space<vmem>>, %arg4: memref<1x2x8x8xf32, #tpu.memory_space<vmem>>, %arg5: memref<1x3x8x8xf32, #tpu.memory_space<vmem>>, %arg6: memref<1x2x32x8xf32, #tpu.memory_space<vmem>>, %arg7: memref<1x2x32x8xf32, #tpu.memory_space<vmem>>, %arg8: memref<1x2x32x8xf32, #tpu.memory_space<vmem>>, %arg9: memref<1x2x1x8xf32, #tpu.memory_space<vmem>>, %arg10: memref<1x2x1x8xf32, #tpu.memory_space<vmem>>, %arg11: memref<1x2x1x8xf32, #tpu.memory_space<vmem>>, %arg12: memref<1x2x3x8xf32, #tpu.memory_space<vmem>>, %arg13: memref<1x3xf32, #tpu.memory_space<vmem>>, %arg14: memref<1x8x3xf32, #tpu.memory_space<vmem>>, %arg15: memref<8x3xf32, #tpu.memory_space<vmem>>) attributes {dimension_semantics = [#tpu.dimension_semantics<parallel>, #tpu.dimension_semantics<parallel>, #tpu.dimension_semantics<arbitrary>], iteration_bounds = array<i64: 2, 1, 2>, scalar_prefetch = 0 : i64, scratch_operands = 1 : i64, tpu.core_type = #tpu.core_type<tc>, window_params = [{transform_indices = @transform_0, window_bounds = array<i64: 1, 8, 32>}, {transform_indices = @transform_1, window_bounds = array<i64: 1, 2, 8, 8>}, {transform_indices = @transform_2, window_bounds = array<i64: 1, 3, 8, 8>}, {transform_indices = @transform_3, window_bounds = array<i64: 1, 2, 32, 8>}, {transform_indices = @transform_4, window_bounds = array<i64: 1, 2, 32, 8>}, {transform_indices = @transform_5, window_bounds = array<i64: 1, 2, 32, 8>}, {transform_indices = @transform_6, window_bounds = array<i64: 1, 2, 1, 8>}, {transform_indices = @transform_7, window_bounds = array<i64: 1, 2, 1, 8>}, {transform_indices = @transform_8, window_bounds = array<i64: 1, 2, 1, 8>}, {transform_indices = @transform_9, window_bounds = array<i64: 1, 2, 3, 8>}, {pipeline_mode = #tpu.pipeline_mode<synchronous>, transform_indices = @transform_10, window_bounds = array<i64: 1, 3>}, {transform_indices = @transform_11, window_bounds = array<i64: 1, 8, 3>}]} {
    %c0 = arith.constant 0 : index
    %c0_0 = arith.constant 0 : index
    %c0_1 = arith.constant 0 : index
    %0 = vector.load %arg3[%c0, %c0_0, %c0_1] : memref<1x8x32xf32, #tpu.memory_space<vmem>>, vector<1x8x32xf32>
    %1 = vector.shape_cast %0 : vector<1x8x32xf32> to vector<8x32xf32>
    %c0_2 = arith.constant 0 : index
    %c0_3 = arith.constant 0 : index
    %c0_4 = arith.constant 0 : index
    %c0_5 = arith.constant 0 : index
    %2 = vector.load %arg6[%c0_2, %c0_3, %c0_4, %c0_5] : memref<1x2x32x8xf32, #tpu.memory_space<vmem>>, vector<1x1x32x8xf32>
    %3 = vector.shape_cast %2 : vector<1x1x32x8xf32> to vector<32x8xf32>
    %cst = arith.constant dense<0.000000e+00> : vector<8x8xf32>
    %4 = tpu.matmul %1, %3, %cst {dimension_numbers = #tpu.dot_dimension_numbers<[1], [0], [0], [1], [0, 0, 1, 1], [], []>} : vector<8x32xf32>, vector<32x8xf32>, vector<8x8xf32> -> vector<8x8xf32>
    %c0_6 = arith.constant 0 : index
    %c0_7 = arith.constant 0 : index
    %c0_8 = arith.constant 0 : index
    %c0_9 = arith.constant 0 : index
    %5 = vector.load %arg9[%c0_6, %c0_7, %c0_8, %c0_9] : memref<1x2x1x8xf32, #tpu.memory_space<vmem>>, vector<1x1x1x8xf32>
    %6 = vector.shape_cast %5 : vector<1x1x1x8xf32> to vector<1x8xf32>
    %7 = vector.broadcast %6 : vector<1x8xf32> to vector<8x8xf32>
    %8 = arith.addf %4, %7 : vector<8x8xf32>
    %c0_10 = arith.constant 0 : index
    %c1 = arith.constant 1 : index
    %c0_11 = arith.constant 0 : index
    %c0_12 = arith.constant 0 : index
    %9 = vector.load %arg6[%c0_10, %c1, %c0_11, %c0_12] : memref<1x2x32x8xf32, #tpu.memory_space<vmem>>, vector<1x1x32x8xf32>
    %10 = vector.shape_cast %9 : vector<1x1x32x8xf32> to vector<32x8xf32>
    %cst_13 = arith.constant dense<0.000000e+00> : vector<8x8xf32>
    %11 = tpu.matmul %1, %10, %cst_13 {dimension_numbers = #tpu.dot_dimension_numbers<[1], [0], [0], [1], [0, 0, 1, 1], [], []>} : vector<8x32xf32>, vector<32x8xf32>, vector<8x8xf32> -> vector<8x8xf32>
    %c0_14 = arith.constant 0 : index
    %c1_15 = arith.constant 1 : index
    %c0_16 = arith.constant 0 : index
    %c0_17 = arith.constant 0 : index
    %12 = vector.load %arg9[%c0_14, %c1_15, %c0_16, %c0_17] : memref<1x2x1x8xf32, #tpu.memory_space<vmem>>, vector<1x1x1x8xf32>
    %13 = vector.shape_cast %12 : vector<1x1x1x8xf32> to vector<1x8xf32>
    %14 = vector.broadcast %13 : vector<1x8xf32> to vector<8x8xf32>
    %15 = arith.addf %11, %14 : vector<8x8xf32>
    %16 = vector.shape_cast %8 : vector<8x8xf32> to vector<1x8x8xf32>
    %17 = vector.shape_cast %15 : vector<8x8xf32> to vector<1x8x8xf32>
    %18 = tpu.concatenate %16, %17 in 0 : vector<1x8x8xf32>, vector<1x8x8xf32> -> vector<2x8x8xf32>
    %c0_18 = arith.constant 0 : index
    %c0_19 = arith.constant 0 : index
    %c0_20 = arith.constant 0 : index
    %c0_21 = arith.constant 0 : index
    %19 = vector.load %arg7[%c0_18, %c0_19, %c0_20, %c0_21] : memref<1x2x32x8xf32, #tpu.memory_space<vmem>>, vector<1x1x32x8xf32>
    %20 = vector.shape_cast %19 : vector<1x1x32x8xf32> to vector<32x8xf32>
    %cst_22 = arith.constant dense<0.000000e+00> : vector<8x8xf32>
    %21 = tpu.matmul %1, %20, %cst_22 {dimension_numbers = #tpu.dot_dimension_numbers<[1], [0], [0], [1], [0, 0, 1, 1], [], []>} : vector<8x32xf32>, vector<32x8xf32>, vector<8x8xf32> -> vector<8x8xf32>
    %c0_23 = arith.constant 0 : index
    %c0_24 = arith.constant 0 : index
    %c0_25 = arith.constant 0 : index
    %c0_26 = arith.constant 0 : index
    %22 = vector.load %arg10[%c0_23, %c0_24, %c0_25, %c0_26] : memref<1x2x1x8xf32, #tpu.memory_space<vmem>>, vector<1x1x1x8xf32>
    %23 = vector.shape_cast %22 : vector<1x1x1x8xf32> to vector<1x8xf32>
    %24 = vector.broadcast %23 : vector<1x8xf32> to vector<8x8xf32>
    %25 = arith.addf %21, %24 : vector<8x8xf32>
    %c0_27 = arith.constant 0 : index
    %c1_28 = arith.constant 1 : index
    %c0_29 = arith.constant 0 : index
    %c0_30 = arith.constant 0 : index
    %26 = vector.load %arg7[%c0_27, %c1_28, %c0_29, %c0_30] : memref<1x2x32x8xf32, #tpu.memory_space<vmem>>, vector<1x1x32x8xf32>
    %27 = vector.shape_cast %26 : vector<1x1x32x8xf32> to vector<32x8xf32>
    %cst_31 = arith.constant dense<0.000000e+00> : vector<8x8xf32>
    %28 = tpu.matmul %1, %27, %cst_31 {dimension_numbers = #tpu.dot_dimension_numbers<[1], [0], [0], [1], [0, 0, 1, 1], [], []>} : vector<8x32xf32>, vector<32x8xf32>, vector<8x8xf32> -> vector<8x8xf32>
    %c0_32 = arith.constant 0 : index
    %c1_33 = arith.constant 1 : index
    %c0_34 = arith.constant 0 : index
    %c0_35 = arith.constant 0 : index
    %29 = vector.load %arg10[%c0_32, %c1_33, %c0_34, %c0_35] : memref<1x2x1x8xf32, #tpu.memory_space<vmem>>, vector<1x1x1x8xf32>
    %30 = vector.shape_cast %29 : vector<1x1x1x8xf32> to vector<1x8xf32>
    %31 = vector.broadcast %30 : vector<1x8xf32> to vector<8x8xf32>
    %32 = arith.addf %28, %31 : vector<8x8xf32>
    %33 = vector.shape_cast %25 : vector<8x8xf32> to vector<1x8x8xf32>
    %34 = vector.shape_cast %32 : vector<8x8xf32> to vector<1x8x8xf32>
    %35 = tpu.concatenate %33, %34 in 0 : vector<1x8x8xf32>, vector<1x8x8xf32> -> vector<2x8x8xf32>
    %c0_36 = arith.constant 0 : index
    %c0_37 = arith.constant 0 : index
    %c0_38 = arith.constant 0 : index
    %c0_39 = arith.constant 0 : index
    %36 = vector.load %arg8[%c0_36, %c0_37, %c0_38, %c0_39] : memref<1x2x32x8xf32, #tpu.memory_space<vmem>>, vector<1x1x32x8xf32>
    %37 = vector.shape_cast %36 : vector<1x1x32x8xf32> to vector<32x8xf32>
    %cst_40 = arith.constant dense<0.000000e+00> : vector<8x8xf32>
    %38 = tpu.matmul %1, %37, %cst_40 {dimension_numbers = #tpu.dot_dimension_numbers<[1], [0], [0], [1], [0, 0, 1, 1], [], []>} : vector<8x32xf32>, vector<32x8xf32>, vector<8x8xf32> -> vector<8x8xf32>
    %c0_41 = arith.constant 0 : index
    %c0_42 = arith.constant 0 : index
    %c0_43 = arith.constant 0 : index
    %c0_44 = arith.constant 0 : index
    %39 = vector.load %arg11[%c0_41, %c0_42, %c0_43, %c0_44] : memref<1x2x1x8xf32, #tpu.memory_space<vmem>>, vector<1x1x1x8xf32>
    %40 = vector.shape_cast %39 : vector<1x1x1x8xf32> to vector<1x8xf32>
    %41 = vector.broadcast %40 : vector<1x8xf32> to vector<8x8xf32>
    %42 = arith.addf %38, %41 : vector<8x8xf32>
    %c0_45 = arith.constant 0 : index
    %c1_46 = arith.constant 1 : index
    %c0_47 = arith.constant 0 : index
    %c0_48 = arith.constant 0 : index
    %43 = vector.load %arg8[%c0_45, %c1_46, %c0_47, %c0_48] : memref<1x2x32x8xf32, #tpu.memory_space<vmem>>, vector<1x1x32x8xf32>
    %44 = vector.shape_cast %43 : vector<1x1x32x8xf32> to vector<32x8xf32>
    %cst_49 = arith.constant dense<0.000000e+00> : vector<8x8xf32>
    %45 = tpu.matmul %1, %44, %cst_49 {dimension_numbers = #tpu.dot_dimension_numbers<[1], [0], [0], [1], [0, 0, 1, 1], [], []>} : vector<8x32xf32>, vector<32x8xf32>, vector<8x8xf32> -> vector<8x8xf32>
    %c0_50 = arith.constant 0 : index
    %c1_51 = arith.constant 1 : index
    %c0_52 = arith.constant 0 : index
    %c0_53 = arith.constant 0 : index
    %46 = vector.load %arg11[%c0_50, %c1_51, %c0_52, %c0_53] : memref<1x2x1x8xf32, #tpu.memory_space<vmem>>, vector<1x1x1x8xf32>
    %47 = vector.shape_cast %46 : vector<1x1x1x8xf32> to vector<1x8xf32>
    %48 = vector.broadcast %47 : vector<1x8xf32> to vector<8x8xf32>
    %49 = arith.addf %45, %48 : vector<8x8xf32>
    %50 = vector.shape_cast %42 : vector<8x8xf32> to vector<1x8x8xf32>
    %51 = vector.shape_cast %49 : vector<8x8xf32> to vector<1x8x8xf32>
    %52 = tpu.concatenate %50, %51 in 0 : vector<1x8x8xf32>, vector<1x8x8xf32> -> vector<2x8x8xf32>
    "tpu.trace_start"() <{level = 10 : i32, message = "hqd,hkd->hqk"}> : () -> ()
    %cst_54 = arith.constant dense<0.000000e+00> : vector<2x8x8xf32>
    %53 = tpu.matmul %18, %35, %cst_54 {dimension_numbers = #tpu.dot_dimension_numbers<[2], [2], [1], [1], [0, 0, 0, 1, 1, 1], [0], [0]>} : vector<2x8x8xf32>, vector<2x8x8xf32>, vector<2x8x8xf32> -> vector<2x8x8xf32>
    "tpu.trace_stop"() : () -> ()
    %c0_55 = arith.constant 0 : index
    %c0_56 = arith.constant 0 : index
    %c0_57 = arith.constant 0 : index
    %c0_58 = arith.constant 0 : index
    %54 = vector.load %arg4[%c0_55, %c0_56, %c0_57, %c0_58] : memref<1x2x8x8xf32, #tpu.memory_space<vmem>>, vector<1x2x8x8xf32>
    %55 = vector.shape_cast %54 : vector<1x2x8x8xf32> to vector<2x8x8xf32>
    %56 = arith.addf %53, %55 : vector<2x8x8xf32>
    %cst_59 = arith.constant dense<0xFF800000> : vector<2x8xf32>
    %57 = vector.multi_reduction <maximumf>, %56, %cst_59 [2] : vector<2x8x8xf32> to vector<2x8xf32>
    %58 = vector.shape_cast %57 : vector<2x8xf32> to vector<2x8x1xf32>
    %59 = vector.broadcast %58 : vector<2x8x1xf32> to vector<2x8x8xf32>
    %60 = arith.subf %56, %59 : vector<2x8x8xf32>
    %61 = math.exp %60 : vector<2x8x8xf32>
    %cst_60 = arith.constant dense<0.000000e+00> : vector<2x8xf32>
    %62 = vector.multi_reduction <add>, %61, %cst_60 [2] : vector<2x8x8xf32> to vector<2x8xf32>
    %63 = vector.shape_cast %62 : vector<2x8xf32> to vector<2x8x1xf32>
    %64 = tpu.reciprocal %63 : vector<2x8x1xf32> -> vector<2x8x1xf32>
    %65 = vector.broadcast %64 : vector<2x8x1xf32> to vector<2x8x8xf32>
    %66 = arith.mulf %61, %65 : vector<2x8x8xf32>
    %c0_61 = arith.constant 0 : index
    %c0_62 = arith.constant 0 : index
    %c0_63 = arith.constant 0 : index
    %c0_64 = arith.constant 0 : index
    %67 = vector.load %arg12[%c0_61, %c0_62, %c0_63, %c0_64] : memref<1x2x3x8xf32, #tpu.memory_space<vmem>>, vector<1x2x3x8xf32>
    %68 = vector.shape_cast %67 : vector<1x2x3x8xf32> to vector<2x3x8xf32>
    "tpu.trace_start"() <{level = 10 : i32, message = "hcd,hmd->hcm"}> : () -> ()
    %cst_65 = arith.constant dense<0.000000e+00> : vector<2x3x8xf32>
    %69 = tpu.matmul %68, %52, %cst_65 {dimension_numbers = #tpu.dot_dimension_numbers<[2], [2], [1], [1], [0, 0, 0, 1, 1, 1], [0], [0]>} : vector<2x3x8xf32>, vector<2x8x8xf32>, vector<2x3x8xf32> -> vector<2x3x8xf32>
    "tpu.trace_stop"() : () -> ()
    %70 = vector.extract_strided_slice %69 {offsets = [0, 0, 0], sizes = [2, 1, 8], strides = [1, 1, 1]} : vector<2x3x8xf32> to vector<2x1x8xf32>
    %71 = vector.broadcast %70 : vector<2x1x8xf32> to vector<2x8x8xf32>
    %72 = arith.mulf %66, %71 : vector<2x8x8xf32>
    %cst_66 = arith.constant dense<0.000000e+00> : vector<8x8xf32>
    %73 = vector.multi_reduction <add>, %72, %cst_66 [0] : vector<2x8x8xf32> to vector<8x8xf32>
    %c0_67 = arith.constant 0 : index
    %c0_68 = arith.constant 0 : index
    %c0_69 = arith.constant 0 : index
    %c0_70 = arith.constant 0 : index
    %74 = vector.load %arg5[%c0_67, %c0_68, %c0_69, %c0_70] : memref<1x3x8x8xf32, #tpu.memory_space<vmem>>, vector<1x1x8x8xf32>
    %75 = vector.shape_cast %74 : vector<1x1x8x8xf32> to vector<8x8xf32>
    %76 = arith.mulf %75, %73 : vector<8x8xf32>
    %cst_71 = arith.constant dense<0.000000e+00> : vector<8xf32>
    %77 = vector.multi_reduction <add>, %76, %cst_71 [1] : vector<8x8xf32> to vector<8xf32>
    %78 = vector.shape_cast %77 : vector<8xf32> to vector<8x1xf32>
    %79 = vector.extract_strided_slice %69 {offsets = [0, 1, 0], sizes = [2, 1, 8], strides = [1, 1, 1]} : vector<2x3x8xf32> to vector<2x1x8xf32>
    %80 = vector.broadcast %79 : vector<2x1x8xf32> to vector<2x8x8xf32>
    %81 = arith.mulf %66, %80 : vector<2x8x8xf32>
    %cst_72 = arith.constant dense<0.000000e+00> : vector<8x8xf32>
    %82 = vector.multi_reduction <add>, %81, %cst_72 [0] : vector<2x8x8xf32> to vector<8x8xf32>
    %c0_73 = arith.constant 0 : index
    %c1_74 = arith.constant 1 : index
    %c0_75 = arith.constant 0 : index
    %c0_76 = arith.constant 0 : index
    %83 = vector.load %arg5[%c0_73, %c1_74, %c0_75, %c0_76] : memref<1x3x8x8xf32, #tpu.memory_space<vmem>>, vector<1x1x8x8xf32>
    %84 = vector.shape_cast %83 : vector<1x1x8x8xf32> to vector<8x8xf32>
    %85 = arith.mulf %84, %82 : vector<8x8xf32>
    %cst_77 = arith.constant dense<0.000000e+00> : vector<8xf32>
    %86 = vector.multi_reduction <add>, %85, %cst_77 [1] : vector<8x8xf32> to vector<8xf32>
    %87 = vector.shape_cast %86 : vector<8xf32> to vector<8x1xf32>
    %88 = vector.extract_strided_slice %69 {offsets = [0, 2, 0], sizes = [2, 1, 8], strides = [1, 1, 1]} : vector<2x3x8xf32> to vector<2x1x8xf32>
    %89 = vector.broadcast %88 : vector<2x1x8xf32> to vector<2x8x8xf32>
    %90 = arith.mulf %66, %89 : vector<2x8x8xf32>
    %cst_78 = arith.constant dense<0.000000e+00> : vector<8x8xf32>
    %91 = vector.multi_reduction <add>, %90, %cst_78 [0] : vector<2x8x8xf32> to vector<8x8xf32>
    %c0_79 = arith.constant 0 : index
    %c2 = arith.constant 2 : index
    %c0_80 = arith.constant 0 : index
    %c0_81 = arith.constant 0 : index
    %92 = vector.load %arg5[%c0_79, %c2, %c0_80, %c0_81] : memref<1x3x8x8xf32, #tpu.memory_space<vmem>>, vector<1x1x8x8xf32>
    %93 = vector.shape_cast %92 : vector<1x1x8x8xf32> to vector<8x8xf32>
    %94 = arith.mulf %93, %91 : vector<8x8xf32>
    %cst_82 = arith.constant dense<0.000000e+00> : vector<8xf32>
    %95 = vector.multi_reduction <add>, %94, %cst_82 [1] : vector<8x8xf32> to vector<8xf32>
    %96 = vector.shape_cast %95 : vector<8xf32> to vector<8x1xf32>
    %97 = tpu.concatenate %78, %87, %96 in 1 : vector<8x1xf32>, vector<8x1xf32>, vector<8x1xf32> -> vector<8x3xf32>
    %c0_i32 = arith.constant 0 : i32
    %98 = arith.cmpi eq, %arg2, %c0_i32 : i32
    %99 = arith.extui %98 : i1 to i32
    %c0_i32_83 = arith.constant 0 : i32
    %100 = arith.cmpi ne, %99, %c0_i32_83 : i32
    scf.if %100 {
      %c0_89 = arith.constant 0 : index
      %c0_90 = arith.constant 0 : index
      %107 = vector.load %arg13[%c0_89, %c0_90] : memref<1x3xf32, #tpu.memory_space<vmem>>, vector<1x3xf32>
      %108 = vector.shape_cast %107 : vector<1x3xf32> to vector<1x3xf32>
      %109 = vector.broadcast %108 : vector<1x3xf32> to vector<8x3xf32>
      %c0_91 = arith.constant 0 : index
      %c0_92 = arith.constant 0 : index
      %110 = vector.load %arg15[%c0_91, %c0_92] : memref<8x3xf32, #tpu.memory_space<vmem>>, vector<8x3xf32>
      tpu.vector_store %arg15[%c0_91, %c0_92], %109 {strides = array<i32>} : memref<8x3xf32, #tpu.memory_space<vmem>>, vector<8x3xf32>,
    } else {
    }
    %c0_84 = arith.constant 0 : index
    %c0_85 = arith.constant 0 : index
    %101 = vector.load %arg15[%c0_84, %c0_85] : memref<8x3xf32, #tpu.memory_space<vmem>>, vector<8x3xf32>
    %102 = arith.addf %101, %97 : vector<8x3xf32>
    %c0_86 = arith.constant 0 : index
    %c0_87 = arith.constant 0 : index
    %103 = vector.load %arg15[%c0_86, %c0_87] : memref<8x3xf32, #tpu.memory_space<vmem>>, vector<8x3xf32>
    tpu.vector_store %arg15[%c0_86, %c0_87], %102 {strides = array<i32>} : memref<8x3xf32, #tpu.memory_space<vmem>>, vector<8x3xf32>,
    %c1_i32 = arith.constant 1 : i32
    %104 = arith.cmpi eq, %arg2, %c1_i32 : i32
    %105 = arith.extui %104 : i1 to i32
    %c0_i32_88 = arith.constant 0 : i32
    %106 = arith.cmpi ne, %105, %c0_i32_88 : i32
    scf.if %106 {
      %c0_89 = arith.constant 0 : index
      %c0_90 = arith.constant 0 : index
      %107 = vector.load %arg15[%c0_89, %c0_90] : memref<8x3xf32, #tpu.memory_space<vmem>>, vector<8x3xf32>
      %c0_91 = arith.constant 0 : index
      %c0_92 = arith.constant 0 : index
      %c0_93 = arith.constant 0 : index
      %108 = vector.load %arg14[%c0_91, %c0_92, %c0_93] : memref<1x8x3xf32, #tpu.memory_space<vmem>>, vector<1x8x3xf32>
      %109 = vector.shape_cast %108 : vector<1x8x3xf32> to vector<8x3xf32>
      %110 = vector.shape_cast %107 : vector<8x3xf32> to vector<1x8x3xf32>
      tpu.vector_store %arg14[%c0_91, %c0_92, %c0_93], %110 {strides = array<i32>} : memref<1x8x3xf32, #tpu.memory_space<vmem>>, vector<1x8x3xf32>,
    } else {
    }
    return
  }
  func.func @transform_0(%arg0: i32, %arg1: i32, %arg2: i32) -> (i32, i32, i32) {
    %c0_i32 = arith.constant 0 : i32
    %c0_i32_0 = arith.constant 0 : i32
    %c0_i32_1 = arith.constant 0 : i32
    return %arg0, %c0_i32, %c0_i32_0 : i32, i32, i32
  }
  func.func @transform_1(%arg0: i32, %arg1: i32, %arg2: i32) -> (i32, i32, i32, i32) {
    %c0_i32 = arith.constant 0 : i32
    %c0_i32_0 = arith.constant 0 : i32
    return %arg0, %arg2, %arg1, %c0_i32 : i32, i32, i32, i32
  }
  func.func @transform_2(%arg0: i32, %arg1: i32, %arg2: i32) -> (i32, i32, i32, i32) {
    %c0_i32 = arith.constant 0 : i32
    %c0_i32_0 = arith.constant 0 : i32
    %c0_i32_1 = arith.constant 0 : i32
    return %arg0, %c0_i32, %arg1, %c0_i32_0 : i32, i32, i32, i32
  }
  func.func @transform_3(%arg0: i32, %arg1: i32, %arg2: i32) -> (i32, i32, i32, i32) {
    %c0_i32 = arith.constant 0 : i32
    %c0_i32_0 = arith.constant 0 : i32
    %c0_i32_1 = arith.constant 0 : i32
    %c0_i32_2 = arith.constant 0 : i32
    return %arg2, %c0_i32, %c0_i32_0, %c0_i32_1 : i32, i32, i32, i32
  }
  func.func @transform_4(%arg0: i32, %arg1: i32, %arg2: i32) -> (i32, i32, i32, i32) {
    %c0_i32 = arith.constant 0 : i32
    %c0_i32_0 = arith.constant 0 : i32
    %c0_i32_1 = arith.constant 0 : i32
    %c0_i32_2 = arith.constant 0 : i32
    return %arg2, %c0_i32, %c0_i32_0, %c0_i32_1 : i32, i32, i32, i32
  }
  func.func @transform_5(%arg0: i32, %arg1: i32, %arg2: i32) -> (i32, i32, i32, i32) {
    %c0_i32 = arith.constant 0 : i32
    %c0_i32_0 = arith.constant 0 : i32
    %c0_i32_1 = arith.constant 0 : i32
    %c0_i32_2 = arith.constant 0 : i32
    return %arg2, %c0_i32, %c0_i32_0, %c0_i32_1 : i32, i32, i32, i32
  }
  func.func @transform_6(%arg0: i32, %arg1: i32, %arg2: i32) -> (i32, i32, i32, i32) {
    %c0_i32 = arith.constant 0 : i32
    %c0_i32_0 = arith.constant 0 : i32
    %c0_i32_1 = arith.constant 0 : i32
    %c0_i32_2 = arith.constant 0 : i32
    return %arg2, %c0_i32, %c0_i32_0, %c0_i32_1 : i32, i32, i32, i32
  }
  func.func @transform_7(%arg0: i32, %arg1: i32, %arg2: i32) -> (i32, i32, i32, i32) {
    %c0_i32 = arith.constant 0 : i32
    %c0_i32_0 = arith.constant 0 : i32
    %c0_i32_1 = arith.constant 0 : i32
    %c0_i32_2 = arith.constant 0 : i32
    return %arg2, %c0_i32, %c0_i32_0, %c0_i32_1 : i32, i32, i32, i32
  }
  func.func @transform_8(%arg0: i32, %arg1: i32, %arg2: i32) -> (i32, i32, i32, i32) {
    %c0_i32 = arith.constant 0 : i32
    %c0_i32_0 = arith.constant 0 : i32
    %c0_i32_1 = arith.constant 0 : i32
    %c0_i32_2 = arith.constant 0 : i32
    return %arg2, %c0_i32, %c0_i32_0, %c0_i32_1 : i32, i32, i32, i32
  }
  func.func @transform_9(%arg0: i32, %arg1: i32, %arg2: i32) -> (i32, i32, i32, i32) {
    %c0_i32 = arith.constant 0 : i32
    %c0_i32_0 = arith.constant 0 : i32
    %c0_i32_1 = arith.constant 0 : i32
    %c0_i32_2 = arith.constant 0 : i32
    return %arg2, %c0_i32, %c0_i32_0, %c0_i32_1 : i32, i32, i32, i32
  }
  func.func @transform_10(%arg0: i32, %arg1: i32, %arg2: i32) -> (i32, i32) {
    %c0_i32 = arith.constant 0 : i32
    %c0_i32_0 = arith.constant 0 : i32
    %c0_i32_1 = arith.constant 0 : i32
    return %c0_i32, %c0_i32_0 : i32, i32
  }
  func.func @transform_11(%arg0: i32, %arg1: i32, %arg2: i32) -> (i32, i32, i32) {
    %c0_i32 = arith.constant 0 : i32
    %c0_i32_0 = arith.constant 0 : i32
    return %arg0, %arg1, %c0_i32 : i32, i32, i32
  }
}

</mosaic_0001>

<bundles_post_ra>
// kernel: tpu_custom_call.1
= control target key start
LH: loop header
LB: loop body
LE: loop exit
PB: predicated region body
PF: predicated region fallthrough
CT: control target
= control target key end

     0   :  { %s2074_s17 = smov 0   ;;  %s2076_s18 = smov 0   ;;  %s2263_s0 = inlined_call_operand.vmem [shape: f32[2,8,32], index: 0, kind: input, shape index: {}]   ;;  %s2264_s1 = inlined_call_operand.vmem [shape: f32[2,4,8,8], index: 1, kind: input, shape index: {}]   ;;  %s2265_s2 = inlined_call_operand.vmem [shape: f32[2,3,8,8], index: 2, kind: input, shape index: {}]   ;;  %s2266_s3 = inlined_call_operand.vmem [shape: f32[2,2,32,8], index: 3, kind: input, shape index: {}]   ;;  %s2267_s4 = inlined_call_operand.vmem [shape: f32[2,2,32,8], index: 4, kind: input, shape index: {}]   ;;  %s2268_s5 = inlined_call_operand.vmem [shape: f32[2,2,32,8], index: 5, kind: input, shape index: {}]   ;;  %s2269_s6 = inlined_call_operand.vmem [shape: f32[2,2,1,8], index: 6, kind: input, shape index: {}]   ;;  %s2270_s7 = inlined_call_operand.vmem [shape: f32[2,2,1,8], index: 7, kind: input, shape index: {}]   ;;  %s2271_s8 = inlined_call_operand.vmem [shape: f32[2,2,1,8], index: 8, kind: input, shape index: {}]   ;;  %s2272_s9 = inlined_call_operand.vmem [shape: f32[2,2,3,8], index: 9, kind: input, shape index: {}]   ;;  %s2273_s10 = inlined_call_operand.vmem [shape: f32[1,3], index: 10, kind: input, shape index: {}]   ;;  %s2274_s11 = inlined_call_operand.vmem [shape: f32[2,8,3], index: 11, kind: output, shape index: {}]  }
   0x1   :  { %s2078_s19 = smov 0   ;;  %s2080_s20 = smov 0  }
   0x2   :  { %s2082_s21 = smov 0  }
   0x3 LB: > { %s33_s22 = sadd.s32 1, %s2002_s19  ;;  %s40_s23 = sadd.s32 1, %s2006_s20  ;;  %s2010_s21 = sphi %s2082_s21, %s21_s21   ;;  %s2006_s20 = sphi %s2080_s20, %s2278_s20   ;;  %s2002_s19 = sphi %s2078_s19, %s2277_s19   ;;  %s1998_s18 = sphi %s2076_s18, %s2276_s18   ;;  %s1994_s17 = sphi %s2074_s17, %s2275_s17  }
   0x4   : > { %p34_p0 = scmp.ge.s32.totalorder %s33_s22, 2  ;;  %p1733_p1 = scmp.ge.s32.totalorder %s2010_s21, 1 }
   0x5   : > { %p461_p2 = scmp.lt.s32.totalorder %s2010_s21, 5 }
   0x6   : > { %s2280_s22 = smov (%p34_p0, %s33_s22), 0  ;;  %s2282_s23 = smov (!%p34_p0, %s40_s23), %s2006_s20 }
   0x7   : > { %p462_p3 = pnand %p1733_p1, %p461_p2  ;;  %p42_p4 = scmp.ge.s32.totalorder %s2282_s23, 2 }
   0x8   : > { %p579_p5 = scmp.lt.s32.totalorder (!%p462_p3), %s1994_s17, 1  ;;  %p554_p6 = scmp.lt.s32.totalorder (!%p462_p3), %s1998_s18, 1 }
   0x9   : > { %s2284_s23 = smov (%p42_p4, %s2282_s23), 0  ;;  %465 = sbr.rel (%p462_p3) target bundleno = 916 (0x394), region = 64 }
   0xa   : > { %p1788_p8 = scmp.ne.s32.totalorder (!%p462_p3), %s1994_s17, 0 }
   0xe   : > { %v2012_v0 = vmov 0.0   ;;  %s2110_s24 = scalar_select %p579_p5, %s1994_s17, 1  ;;  %vm2013_vm0 = vmmov 0   ;;  %vm630_vm1 = vcmask 261120   ;;  %vm1117_vm2 = vcmask 64512  }
   0xf   : > { %1835 = vmatprep.subr.mxu0 %v2012_v0  ;;  %1846 = vmatprep.subr.mxu1 %v2012_v0  ;;  %s2286_s18 = smov (!%p554_p6, %s1998_s18), 1  ;;  %vm1502_vm3 = vcmask 7168   ;;  %vm1504_vm4 = vcmask 15360  }
  0x10   : > { %1843 = vmatprep.mubr.msk.f32.mxu0 %vm2013_vm0, %v2012_v0  ;;  %1854 = vmatprep.mubr.msk.f32.mxu1 %vm2013_vm0, %v2012_v0  ;;  %s2119_s25 = sshll.u32 %s2110_s24, 6  ;;  %s1734_s29 = sshll.u32 %s2286_s18, 3 }
  0x11   : > { %s583_s28 = scalar_lea.vmem %s2266_s3, %s2119_s25  ;;  %s2129_s13 = scalar_lea.vmem %s2274_s11, %s1734_s29 }
  0x12   : > { %v622_v1 = vld [vmem:[%s583_s28 + $0x18] sm:$0xff]  ;;  %v621_v3 = vld [vmem:[%s583_s28 + $0x10] sm:$0xff]  ;;  %v620_v5 = vld [vmem:[%s583_s28 + $0x8] sm:$0xff]  ;;  %s557_s16 = scalar_lea.vmem %s2263_s0, %s1734_s29  ;;  %s588_s30 = scalar_lea.vmem %s2267_s4, %s2119_s25 }
  0x13   : > { %v1756_v2 = vld [vmem:[%s583_s28 + $0x38] sm:$0xff]  ;;  %1836 = vmatpush3.msra.mxu0 %v622_v1  ;;  %v1755_v4 = vld [vmem:[%s583_s28 + $0x30] sm:$0xff]  ;;  %v1754_v6 = vld [vmem:[%s583_s28 + $0x28] sm:$0xff]  ;;  %s593_s12 = scalar_lea.vmem %s2268_s5, %s2119_s25  ;;  %s1745_s25 = sshll.u32 %s2110_s24, 1 }
  0x14   : > { %1847 = vmatpush3.msra.mxu1 %v1756_v2  ;;  %1837 = vmatprep.subr.mxu0 %v2012_v0  ;;  %v619_v7 = vld [vmem:[%s583_s28] sm:$0xff]  ;;  %v790_v10 = vld [vmem:[%s588_s30 + $0x18] sm:$0xff]  ;;  %v789_v12 = vld [vmem:[%s588_s30 + $0x10] sm:$0xff]  ;;  %s1796_s14 = sshll.u32 %s2110_s24, 3  ;;  %s1736_s27 = sshll.u32 %s2286_s18, 2 }
  0x15   : > { %1848 = vmatprep.subr.mxu1 %v2012_v0  ;;  %1838 = vmatpush3.msra.mxu0 %v621_v3  ;;  %v1753_v8 = vld [vmem:[%s583_s28 + $0x20] sm:$0xff]  ;;  %v1765_v11 = vld [vmem:[%s588_s30 + $0x38] sm:$0xff]  ;;  %v1764_v13 = vld [vmem:[%s588_s30 + $0x30] sm:$0xff]  ;;  %s610_s26 = scalar_lea.vmem %s2272_s9, %s1796_s14  ;;  %s1921_s14 = smul.u32 24, %s2286_s18 }
  0x16   : > { %1849 = vmatpush3.msra.mxu1 %v1755_v4  ;;  %1839 = vmatprep.subr.mxu0 %v2012_v0  ;;  %v2142_v9 = vld [vmem:[%s557_s16] sm:$0xff]  ;;  %v788_v14 = vld [vmem:[%s588_s30 + $0x8] sm:$0xff]  ;;  %v954_v18 = vld [vmem:[%s593_s12 + $0x18] sm:$0xff]  ;;  %s601_s16 = scalar_lea.vmem %s2270_s7, %s1745_s25 }
  0x17   : > { %1850 = vmatprep.subr.mxu1 %v2012_v0  ;;  %1840 = vmatpush3.msra.mxu0 %v620_v5  ;;  %v1763_v15 = vld [vmem:[%s588_s30 + $0x28] sm:$0xff]  ;;  %v787_v16 = vld [vmem:[%s588_s30] sm:$0xff]  ;;  %v1774_v19 = vld [vmem:[%s593_s12 + $0x38] sm:$0xff] }
  0x18   : > { %1851 = vmatpush3.msra.mxu1 %v1754_v6  ;;  %1841 = vmatprep.subr.mxu0 %v2012_v0  ;;  %v1762_v17 = vld [vmem:[%s588_s30 + $0x20] sm:$0xff]  ;;  %v953_v20 = vld [vmem:[%s593_s12 + $0x10] sm:$0xff]  ;;  %v952_v22 = vld [vmem:[%s593_s12 + $0x8] sm:$0xff]  ;;  %s597_s30 = scalar_lea.vmem %s2269_s6, %s1745_s25 }
  0x19   : > { %1852 = vmatprep.subr.mxu1 %v2012_v0  ;;  %1842 = vmatpush3.msra.mxu0 %v619_v7  ;;  %v1773_v21 = vld [vmem:[%s593_s12 + $0x30] sm:$0xff]  ;;  %v1772_v23 = vld [vmem:[%s593_s12 + $0x28] sm:$0xff]  ;;  %v951_v24 = vld [vmem:[%s593_s12] sm:$0xff] }
  0x1a   : > { %1853 = vmatpush3.msra.mxu1 %v1753_v8  ;;  %1844 = vmatmul.mubr.msk.f32.vlgmr.msra.gmra.mxu0 %vm630_vm1, %v2142_v9  ;;  %v1771_v25 = vld [vmem:[%s593_s12 + $0x20] sm:$0xff]  ;;  %s605_s12 = scalar_lea.vmem %s2271_s8, %s1745_s25  ;;  %s1735_s25 = sshll.u32 %s1994_s17, 1 }
  0x1b   : > { %1857 = vmatprep.subr.mxu0 %v2012_v0  ;;  %1868 = vmatprep.subr.mxu1 %v2012_v0  ;;  %v1760_v30 = vld [vmem:[%s601_s16] ss:$0 sm:$0xff]  ;;  %v1767_v31 = vld [vmem:[%s601_s16 + $0x1] ss:$0 sm:$0xff]  ;;  %v1293_v51 = vld [vmem:[%s610_s26 + $0x4] sm:$0x7] }
  0x1c   : > { %1855 = vmatmul.mubr.msk.f32.vlgmr.msra.gmra.mxu1 %vm630_vm1, %v2142_v9  ;;  %1858 = vmatpush3.msra.mxu0 %v790_v10  ;;  %v1751_v34 = vld [vmem:[%s597_s30] ss:$0 sm:$0xff]  ;;  %v1758_v35 = vld [vmem:[%s597_s30 + $0x1] ss:$0 sm:$0xff]  ;;  %p561_p7 = scmp.lt.s32.totalorder %s1735_s25, 3 }
  0x1d   : > { %1869 = vmatpush3.msra.mxu1 %v1765_v11  ;;  %1859 = vmatprep.subr.mxu0 %v2012_v0  ;;  %v1769_v42 = vld [vmem:[%s605_s12] ss:$0 sm:$0xff]  ;;  %v1776_v44 = vld [vmem:[%s605_s12 + $0x1] ss:$0 sm:$0xff] }
  0x1e   : > { %1870 = vmatprep.subr.mxu1 %v2012_v0  ;;  %1860 = vmatpush3.msra.mxu0 %v789_v12  ;;  %v1292_v50 = vld [vmem:[%s610_s26] sm:$0x7]  ;;  %s2288_s25 = smov (!%p561_p7, %s1735_s25), 3  ;;  %s578_s26 = scalar_lea.vmem %s2265_s2, %s1921_s14 }
  0x1f   : > { %1871 = vmatpush3.msra.mxu1 %v1764_v13  ;;  %1861 = vmatprep.subr.mxu0 %v2012_v0  ;;  %s567_s30 = sadd.s32 %s1736_s27, %s2288_s25  ;;  %v1446_v13 = vlaneseq }
  0x20   : > { %1872 = vmatprep.subr.mxu1 %v2012_v0  ;;  %1862 = vmatpush3.msra.mxu0 %v788_v14  ;;  %s1737_s28 = sshll.u32 %s567_s30, 3 }
  0x21   : > { %1873 = vmatpush3.msra.mxu1 %v1763_v15  ;;  %1863 = vmatprep.subr.mxu0 %v2012_v0  ;;  %s569_s24 = scalar_lea.vmem %s2264_s1, %s1737_s28  ;;  %v1447_v15 = vshrl.u32 %v1446_v13, 7 }
  0x22   : > { %1874 = vmatprep.subr.mxu1 %v2012_v0  ;;  %1864 = vmatpush3.msra.mxu0 %v787_v16  ;;  %v1115_v52 = vld [vmem:[%s569_s24] sm:$0xff]  ;;  %v1116_v54 = vld [vmem:[%s569_s24 + $0x8] sm:$0xff] }
  0x23   : > { %1865 = vmatprep.mubr.msk.f32.mxu0 %vm2013_vm0, %v2012_v0  ;;  %1875 = vmatpush3.msra.mxu1 %v1762_v17  ;;  %v1448_v16 = vsub.s32 0, %v1447_v15  ;;  %v1466_v17 = vsub.s32 1, %v1447_v15 }
  0x24   : > { %1876 = vmatprep.mubr.msk.f32.mxu1 %vm2013_vm0, %v2012_v0  ;;  %1866 = vmatmul.mubr.msk.f32.vlgmr.msra.gmra.mxu0 %vm630_vm1, %v2142_v9 }
  0x25   : > { %1877 = vmatmul.mubr.msk.f32.vlgmr.msra.gmra.mxu1 %vm630_vm1, %v2142_v9  ;;  %1879 = vmatprep.subr.mxu0 %v2012_v0 }
  0x26   : > { %1890 = vmatprep.subr.mxu1 %v2012_v0  ;;  %1887 = vmatprep.mubr.msk.f32.mxu0 %vm2013_vm0, %v2012_v0 }
  0x27   : > { %1898 = vmatprep.mubr.msk.f32.mxu1 %vm2013_vm0, %v2012_v0  ;;  %1880 = vmatpush3.msra.mxu0 %v954_v18  ;;  %v1485_v18 = vsub.s32 2, %v1447_v15 }
  0x28   : > { %1891 = vmatpush3.msra.mxu1 %v1774_v19  ;;  %1881 = vmatprep.subr.mxu0 %v2012_v0 }
  0x29   : > { %1892 = vmatprep.subr.mxu1 %v2012_v0  ;;  %1882 = vmatpush3.msra.mxu0 %v953_v20 }
  0x2a   : > { %1893 = vmatpush3.msra.mxu1 %v1773_v21  ;;  %1883 = vmatprep.subr.mxu0 %v2012_v0 }
  0x2b   : > { %1894 = vmatprep.subr.mxu1 %v2012_v0  ;;  %1884 = vmatpush3.msra.mxu0 %v952_v22 }
  0x2c   : > { %1895 = vmatpush3.msra.mxu1 %v1772_v23  ;;  %1885 = vmatprep.subr.mxu0 %v2012_v0 }
  0x2d   : > { %1896 = vmatprep.subr.mxu1 %v2012_v0  ;;  %1886 = vmatpush3.msra.mxu0 %v951_v24 }
  0x2e   : > { %1888 = vmatmul.mubr.msk.f32.vlgmr.msra.gmra.mxu0 %vm630_vm1, %v2142_v9  ;;  %1901 = vmatprep.subr.mxu0 %v2012_v0 }
  0x2f   : > { %1897 = vmatpush3.msra.mxu1 %v1771_v25  ;;  %1903 = vmatprep.mubr.msk.f32.mxu0 %vm2013_vm0, %v2012_v0 }
  0x30   : > { %1899 = vmatmul.mubr.msk.f32.vlgmr.msra.gmra.mxu1 %vm630_vm1, %v2142_v9  ;;  %1906 = vmatprep.subr.mxu1 %v2012_v0 }
  0x31   : > { %1908 = vmatprep.mubr.msk.f32.mxu1 %vm2013_vm0, %v2012_v0 }
  0xda   : > { %v700_v26 = vpop.f32.mrf.mxu0 }
  0xdb   : > { %v701_v40 = vadd.f32 %v1751_v34, %v700_v26 }
  0xdc   : > { %v783_v27 = vpop.f32.mrf.mxu1  ;;  %v1845_v28 = vpop.f32.mrf.mxu0 }
  0xdd   : > { %v784_v41 = vadd.f32 %v1758_v35, %v783_v27 }
  0xde   : > { %v1856_v29 = vpop.f32.mrf.mxu1 }
  0xe4   : > { %v864_v32 = vpop.f32.mrf.mxu0 }
  0xe5   : > { %v947_v33 = vpop.f32.mrf.mxu1  ;;  %v865_v36 = vadd.f32 %v1760_v30, %v864_v32 }
  0xe6   : > { %v948_v37 = vadd.f32 %v1767_v31, %v947_v33  ;;  %v1867_v38 = vpop.f32.mrf.mxu0 }
  0xe7   : > { %v1878_v39 = vpop.f32.mrf.mxu1  ;;  %1902 = vmatpush3.xpose.msk.msra.mxu0 %vm1117_vm2, %v865_v36  ;;  %v1786_v38 = vld [vmem:[%s578_s26 + $0x8] sm:$0xff] }
  0xe8   : > { %1907 = vmatpush3.xpose.msk.msra.mxu1 %vm1117_vm2, %v948_v37  ;;  %1911 = vmatprep.subr.mxu0 %v2012_v0 }
  0xe9   : > { %1916 = vmatprep.subr.mxu1 %v2012_v0 }
  0xea   : > { %1904 = vmatmul.mubr.msk.f32.vlgmr.msra.gmra.mxu0 %vm1117_vm2, %v701_v40  ;;  %v1459_v40 = vld [vmem:[%s578_s26] sm:$0xff] }
  0xeb   : > { %1909 = vmatmul.mubr.msk.f32.vlgmr.msra.gmra.mxu1 %vm1117_vm2, %v784_v41  ;;  %1913 = vmatprep.mubr.msk.f32.mxu0 %vm2013_vm0, %v2012_v0 }
  0xec   : > { %1918 = vmatprep.mubr.msk.f32.mxu1 %vm2013_vm0, %v2012_v0 }
  0xee   : > { %v1028_v43 = vpop.f32.mrf.mxu0 }
  0xef   : > { %v1029_v45 = vadd.f32 %v1769_v42, %v1028_v43 }
  0xf0   : > { %v1111_v46 = vpop.f32.mrf.mxu1  ;;  %v1889_v47 = vpop.f32.mrf.mxu0 }
  0xf1   : > { %v1112_v48 = vadd.f32 %v1776_v44, %v1111_v46  ;;  %1912 = vmatpush3.xpose.msk.msra.mxu0 %vm1117_vm2, %v1029_v45  ;;  %v1787_v46 = vld [vmem:[%s578_s26 + $0x10] sm:$0xff] }
  0xf2   : > { %v1900_v49 = vpop.f32.mrf.mxu1 }
  0xf3   : > { %1917 = vmatpush3.xpose.msk.msra.mxu1 %vm1117_vm2, %v1112_v48 }
  0xf4   : > { %1914 = vmatmul.mubr.msk.f32.vlgmr.msra.gmra.mxu0 %vm1117_vm2, %v1292_v50 }
  0xf6   : > { %1919 = vmatmul.mubr.msk.f32.vlgmr.msra.gmra.mxu1 %vm1117_vm2, %v1293_v51 }
 0x1aa   : > { %v1190_v53 = vpop.f32.mrf.mxu0 }
 0x1ab   : > { %v1266_v55 = vpop.f32.mrf.mxu1  ;;  %v1191_v56 = vadd.f32 %v1190_v53, %v1115_v52 }
 0x1ac   : > { %v1905_v57 = vpop.f32.mrf.mxu0  ;;  %v1267_v59 = vadd.f32 %v1266_v55, %v1116_v54 }
 0x1ad   : > { %v1910_v58 = vpop.f32.mrf.mxu1  ;;  %v1270_v60 = vsel %vm1117_vm2, %v1191_v56, -inf }
 0x1ae   : > { %1271 = vmax.xlane.f32.xlu0 %v1270_v60  ;;  %v1273_v61 = vsel %vm1117_vm2, %v1267_v59, -inf }
 0x1b2   : > { %1274 = vmax.xlane.f32.xlu0 %v1273_v61 }
 0x1b4   : > { %v1366_v8 = vpop.f32.mrf.mxu0 }
 0x1b5   : > { %v1449_v20 = vrot.slane %v1366_v8, %v1448_v16  ;;  %v1467_v21 = vrot.slane %v1366_v8, %v1466_v17  ;;  %v1486_v23 = vrot.slane %v1366_v8, %v1485_v18 }
 0x1b6   : > { %v1442_v9 = vpop.f32.mrf.mxu1  ;;  %v1915_v10 = vpop.f32.mrf.mxu0 }
 0x1b7   : > { %v1453_v24 = vrot.slane %v1442_v9, %v1448_v16  ;;  %v1471_v25 = vrot.slane %v1442_v9, %v1466_v17  ;;  %v1490_v26 = vrot.slane %v1442_v9, %v1485_v18 }
 0x1b8   : > { %v1920_v11 = vpop.f32.mrf.mxu1 }
 0x237   : > { %v1272_v62 = vpop.xlane.xlu0 %1271 }
 0x238   : > { %v1276_v63 = vsub.f32 %v1191_v56, %v1272_v62 }
 0x23a   : > { %v1278_v0 = vmul.f32 1.442695, %v1276_v63 }
 0x23b   : > { %v1275_v1 = vpop.xlane.xlu0 %1274 }
 0x23c   : > { %1964 = vpow2.f32 %v1278_v0  ;;  %v1277_v2 = vsub.f32 %v1267_v59, %v1275_v1 }
 0x23e   : > { %v1280_v3 = vmul.f32 1.442695, %v1277_v2 }
 0x240   : > { %1966 = vpow2.f32 %v1280_v3 }
 0x249   : > { %v1965_v4 = vpop.eup %1964 }
 0x24a   : > { %v1282_v5 = vsel %vm1117_vm2, %v1965_v4, 0.0 }
 0x24b   : > { %1283 = vadd.xlane.f32.xlu1 %v1282_v5 }
 0x24d   : > { %v1967_v6 = vpop.eup %1966 }
 0x24e   : > { %v1285_v7 = vsel %vm1117_vm2, %v1967_v6, 0.0 }
 0x24f   : > { %1286 = vadd.xlane.f32.xlu1 %v1285_v7 }
 0x2d4   : > { %v1284_v12 = vpop.xlane.xlu1 %1283 }
 0x2d5   : > { %1968 = vrcp.f32 %v1284_v12 }
 0x2d8   : > { %v1287_v14 = vpop.xlane.xlu1 %1286 }
 0x2d9   : > { %1970 = vrcp.f32 %v1287_v14 }
 0x2e2   : > { %v1969_v19 = vpop.eup %1968 }
 0x2e3   : > { %v1290_v22 = vmul.f32 %v1969_v19, %v1965_v4 }
 0x2e5   : > { %v1454_v28 = vmul.f32 %v1449_v20, %v1290_v22  ;;  %v1472_v29 = vmul.f32 %v1467_v21, %v1290_v22  ;;  %v1491_v30 = vmul.f32 %v1486_v23, %v1290_v22 }
 0x2e6   : > { %v1971_v27 = vpop.eup %1970 }
 0x2e7   : > { %v1291_v31 = vmul.f32 %v1971_v27, %v1967_v6  ;;  %v1474_v35 = vsel %vm1117_vm2, %v1472_v29, 0.0  ;;  %v1456_v36 = vsel %vm1117_vm2, %v1454_v28, 0.0  ;;  %v1493_v41 = vsel %vm1117_vm2, %v1491_v30, 0.0 }
 0x2e9   : > { %v1455_v32 = vmul.f32 %v1453_v24, %v1291_v31  ;;  %v1473_v33 = vmul.f32 %v1471_v25, %v1291_v31  ;;  %v1492_v34 = vmul.f32 %v1490_v26, %v1291_v31 }
 0x2eb   : > { %v1475_v37 = vsel %vm1117_vm2, %v1473_v33, 0.0  ;;  %v1457_v39 = vsel %vm1117_vm2, %v1455_v32, 0.0  ;;  %v1494_v42 = vsel %vm1117_vm2, %v1492_v34, 0.0 }
 0x2ec   : > { %v1476_v43 = vadd.f32 %v1475_v37, %v1474_v35  ;;  %v1458_v44 = vadd.f32 %v1457_v39, %v1456_v36  ;;  %v1495_v45 = vadd.f32 %v1494_v42, %v1493_v41 }
 0x2ee   : > { %v1479_v47 = vmul.f32 %v1786_v38, %v1476_v43  ;;  %v1460_v48 = vmul.f32 %v1459_v40, %v1458_v44  ;;  %v1498_v51 = vmul.f32 %v1787_v46, %v1495_v45 }
 0x2f0   : > { %v1480_v49 = vsel %vm1117_vm2, %v1479_v47, 0.0  ;;  %v1461_v50 = vsel %vm1117_vm2, %v1460_v48, 0.0  ;;  %v1499_v52 = vsel %vm1117_vm2, %v1498_v51, 0.0 }
 0x2f1   : > { %1481 = vadd.xlane.f32.xlu1 %v1480_v49  ;;  %1462 = vadd.xlane.f32.xlu0 %v1461_v50 }
 0x2f5   : > { %1500 = vadd.xlane.f32.xlu0 %v1499_v52 }
 0x37a   : > { %v1463_v53 = vpop.xlane.xlu0 %1462  ;;  %v1482_v54 = vpop.xlane.xlu1 %1481 }
 0x37b   : > { %v1503_v55 = vsel %vm1502_vm3, %v1463_v53, %v1482_v54  ;;  %1509 = sbr.rel (%p1788_p8) target bundleno = 898 (0x382), region = 68 }
 0x37e   : > { %v1501_v56 = vpop.xlane.xlu0 %1500 }
 0x37f   : > { %v1505_v57 = vsel %vm1504_vm4, %v1503_v55, %v1501_v56 }
 0x380   : > { %v1789_v58 = vld [vmem:[%s2273_s10] ss:$0 sm:$0xff]  ;;  %vm1517_vm5 = vcmask 23552  }
 0x381   : > { %1518 = vst.msk [vmem:[#allocation2] sm:$0xff] %vm1517_vm5, %v1789_v58 }
 0x382 PF: > { %vm1521_vm6 = vcmask 23552   ;;  %p1790_p9 = scmp.ne.s32.totalorder %s1994_s17, 1 }
 0x387   : > { %1526 = sbr.rel (%p1790_p9) target bundleno = 916 (0x394), region = 72 }
 0x388   : > { %v1519_v59 = vld [vmem:[#allocation2] sm:$0xff] }
 0x389   : > { %v1520_v60 = vadd.f32 %v1519_v59, %v1505_v57 }
 0x38b   : > { %1522 = vst.msk [vmem:[#allocation2] sm:$0xff] %vm1521_vm6, %v1520_v60 }
 0x392   : > { %v1527_v61 = vld [vmem:[#allocation2] sm:$0xff] }
 0x393   : > { %1528 = vst.msk [vmem:[%s2129_s13] sm:$0xff] %vm1521_vm6, %v1527_v61 }
 0x394 PF: > { %s21_s21 = sadd.s32 1, %s2010_s21   ;;  %s2275_s17 = smov %s2002_s19 }
 0x395   : > { %p18_p10 = scmp.ge.s32.totalorder %s21_s21, 6   ;;  %s2276_s18 = smov %s2006_s20 }
 0x396   : > { %s2277_s19 = smov %s2280_s22  ;;  %s2278_s20 = smov %s2284_s23 }
 0x397   :  { %20 = sbr.rel (!%p18_p10) target bundleno = 3 (0x3), region = 137 }

</bundles_post_ra>
